<compile_context>
chip_gen: v5e
topology: v5e:2x2
jax: 0.10.0
libtpu: 0.0.40
codegen_flags: <defaults>
</compile_context>

<pallas_src>
import jax
import jax.numpy as jnp
from jax.experimental import pallas as pl
from jax.experimental.pallas import tpu as pltpu

_LANE = 128


def _vmem_capacity_bytes():
    """Per-TensorCore VMEM (128 MiB v5e/v6e, 64 MiB v7x); conservative 64 MiB fallback."""
    try:
        info = pltpu.get_tpu_info()
        cap = getattr(info, "vmem_capacity_bytes", None)
        if cap:
            return int(cap)
    except Exception:
        pass
    return 64 * 1024 * 1024


def _round_up(x, m):
    return -(-x // m) * m


def _choose_time_tiling(T, C, nout, in_itemsize, out_itemsize, compute_itemsize,
                        tile_budget_bytes, B):
    """Pick (t_tile, nT): as large as the VMEM budget allows (amortize per-step overhead),
    capped at 8192 lanes, rounded to the 128-lane width, and split into >= 2 time tiles
    when B == 1 so both v7x TensorCores get work."""
    per_col = (2 * in_itemsize * C            # x block, double buffered
               + 2 * out_itemsize * nout      # out block, double buffered
               + 4 * nout                     # f32 accumulator
               + 3 * compute_itemsize * C)    # xc + shifted-view temporaries
    budget_cols = max(_LANE, tile_budget_bytes // per_col)
    t_cap = max(_LANE, min(8192, (budget_cols // _LANE) * _LANE))
    nT = max(1, -(-T // t_cap))
    if B == 1 and nT == 1 and T > _LANE:
        nT = 2                                # v7x: 2 TCs per chip; don't idle one for B == 1
    t_tile = _round_up(-(-T // nT), _LANE)
    return t_tile, nT


def extend_conv1d_pallas(x, weights, biases, kernels, *,
                         compute_dtype=jnp.bfloat16, out_dtype=None, t_tile=None):
    """ExtendConv('1d', ...) forward as one fused Pallas TPU kernel.

    x             : [B, C, T]
    weights       : list, weights[i] has shape [nfilter, C, kernels[i]]
    biases        : list, biases[i] has shape [nfilter]
    kernels       : list of odd kernel sizes; stride=1, dilation=1, groups=1,
                    padding=(k-1)//2 (same-length output, matching the module).
    compute_dtype : MXU input dtype. bf16 (default) is an intentional precision
                    reduction vs the f32 torch reference; pass jnp.float32 for full accuracy.
    out_dtype     : output dtype (default: x.dtype).  bf16 halves the dominant HBM
                    writeback term for this nout >= C kernel.
    returns       : [B, len(kernels)*nfilter, T]
    """
    B, C, T = x.shape
    nfilter = weights[0].shape[0]
    n_conv = len(kernels)
    nout = n_conv * nfilter
    for k in kernels:
        assert k % 2 == 1, "only odd kernel sizes keep the sequence length with (k-1)//2 padding"

    K_max = max(kernels)
    pad_max = (K_max - 1) // 2
    out_dtype = jnp.dtype(x.dtype) if out_dtype is None else jnp.dtype(out_dtype)
    compute_dtype = jnp.dtype(compute_dtype)

    # ---- VMEM-aware tiling + vmem limit (128 MiB v5e/v6e -> ~96 MiB; 64 MiB v7x -> ~48 MiB) ------
    cap = _vmem_capacity_bytes()
    vmem_limit = max(32 * 2**20, min(cap * 3 // 4, 100 * 2**20))
    if t_tile is None:
        t_tile, nT = _choose_time_tiling(
            T, C, nout, x.dtype.itemsize, out_dtype.itemsize, compute_dtype.itemsize,
            tile_budget_bytes=int(vmem_limit * 0.7), B=B)
    else:
        assert t_tile % _LANE == 0, "t_tile must be a multiple of 128 (lane width)"
        nT = max(1, -(-T // t_tile))
    T_pad = nT * t_tile
    assert pad_max <= t_tile, \
        "halo only covers one neighbouring tile: need (K_max-1)//2 <= t_tile"

    # Pad time to a lane-aligned multiple of t_tile -> lane-dense (unmasked) output stores.
    x_pad = x if T_pad == T else jnp.pad(x, ((0, 0), (0, 0), (0, T_pad - T)))

    # ---- per-tap weights (K_max, nout, C): tap j multiplies x[t + j - pad_max].  Smaller convs
    # are centred inside the K_max window by zero-padding, so every conv shares the same taps. ----
    w_all = jnp.zeros((K_max, nout, C), jnp.float32)
    for ci, (w, k) in enumerate(zip(weights, kernels)):
        off = pad_max - (k - 1) // 2
        w_all = w_all.at[off:off + k, ci * nfilter:(ci + 1) * nfilter, :].set(
            jnp.transpose(w, (2, 0, 1)).astype(jnp.float32))
    w_all = w_all.astype(compute_dtype)
    b_all = jnp.concatenate(biases).reshape(nout, 1).astype(jnp.float32)

    # ---- tiny halo (B*nT, C, 2*pad_max) instead of padding all of x in time ----------------------
    # row r = b*nT + t :  [:, :pad_max] = x_pad[b,:, t*t_tile-pad : t*t_tile]   (zeros for t == 0)
    #                     [:, pad_max:] = x_pad[b,:, (t+1)*t_tile : +pad]       (zeros for t == nT-1)
    if pad_max > 0:
        x_r = x_pad.reshape(B, C, nT, t_tile)
        zeros = jnp.zeros((B, C, 1, pad_max), x_pad.dtype)
        left = jnp.concatenate([zeros, x_r[:, :, :-1, t_tile - pad_max:]], axis=2)
        right = jnp.concatenate([x_r[:, :, 1:, :pad_max], zeros], axis=2)
        halo = jnp.transpose(jnp.concatenate([left, right], axis=3), (0, 2, 1, 3))
        halo = halo.reshape(B * nT, C, 2 * pad_max)
    else:
        halo = None

    def kernel(*refs):
        if pad_max > 0:
            x_ref, halo_ref, w_ref, b_ref, out_ref = refs
        else:
            x_ref, w_ref, b_ref, out_ref = refs

        # Cast once, immediately after the auto-pipelined load: all shifted views are compute_dtype.
        xc = x_ref[0].astype(compute_dtype)                         # (C, t_tile)
        if pad_max > 0:
            b_i = pl.program_id(0)
            t_i = pl.program_id(1)
            h = halo_ref[b_i * nT + t_i].astype(compute_dtype)      # (C, 2*pad_max), resident block

        # K_max small MXU dots on lane-shifted views: no (K_max*C, t_tile) im2col slab, no padded
        # full-width window blend, no second full-buffer cast.  MXU is far from the bottleneck at
        # these shapes, so K small dots beat one deep one plus the copies it required.
        acc = None
        for j in range(K_max):
            d = j - pad_max                                         # static tap shift
            if d == 0:
                s = xc
            elif d < 0:
                s = jnp.concatenate([h[:, pad_max + d:pad_max], xc[:, :t_tile + d]], axis=1)
            else:
                s = jnp.concatenate([xc[:, d:], h[:, pad_max:pad_max + d]], axis=1)
            part = jnp.dot(w_ref[j], s, preferred_element_type=jnp.float32)
            acc = part if acc is None else acc + part

        out_ref[0] = (acc + b_ref[...]).astype(out_ref.dtype)       # f32 bias add, lane-dense store

    in_specs = [pl.BlockSpec((1, C, t_tile), lambda b, t: (b, 0, t))]
    inputs = [x_pad]
    if pad_max > 0:
        # Whole halo resident in VMEM (constant index_map -> fetched once), indexed by program id
        # inside the kernel: removes B*nT tiny per-step DMAs.
        in_specs.append(pl.BlockSpec((B * nT, C, 2 * pad_max), lambda b, t: (0, 0, 0)))
        inputs.append(halo)
    in_specs += [pl.BlockSpec((K_max, nout, C), lambda b, t: (0, 0, 0)),   # resident weights
                 pl.BlockSpec((nout, 1), lambda b, t: (0, 0))]             # resident bias
    inputs += [w_all, b_all]

    out_spec = pl.BlockSpec((1, nout, t_tile), lambda b, t: (b, 0, t))

    flops = 2 * B * T_pad * nout * K_max * C
    bytes_accessed = (x_pad.size * x_pad.dtype.itemsize
                      + B * nout * T_pad * out_dtype.itemsize
                      + w_all.size * w_all.dtype.itemsize
                      + (halo.size * halo.dtype.itemsize if halo is not None else 0)
                      + b_all.size * 4)

    fn = pl.pallas_call(
        kernel,
        out_shape=jax.ShapeDtypeStruct((B, nout, T_pad), out_dtype),
        grid_spec=pltpu.PrefetchScalarGridSpec(
            num_scalar_prefetch=0,
            grid=(B, nT),
            in_specs=in_specs,
            out_specs=out_spec,
        ),
        compiler_params=pltpu.CompilerParams(
            # Both axes are independent -> shard across both TensorCores on v7x.
            dimension_semantics=("parallel", "parallel"),
            vmem_limit_bytes=int(vmem_limit),
        ),
        cost_estimate=pl.CostEstimate(flops=flops, transcendentals=0,
                                      bytes_accessed=bytes_accessed),
    )
    out = fn(*inputs)
    if T_pad != T:
        out = out[:, :, :T]
    return out


def extend_conv1d_ref(x, weights, biases, kernels):
    """Pure-JAX reference (mirrors torch.nn.Conv1d + cat along channel dim)."""
    outs = []
    for w, b, k in zip(weights, biases, kernels):
        pad = (k - 1) // 2
        o = jax.lax.conv_general_dilated(
            x, w, window_strides=(1,), padding=[(pad, pad)],
            dimension_numbers=("NCH", "OIH", "NCH"))
        outs.append(o + b[None, :, None])
    return jnp.concatenate(outs, axis=1)


if __name__ == "__main__":
    # Module config: conv_type='1d', ninp=4, nfilter=8,
    # kernels=[3,5], strides=[1,1], dilations=[1,1], groups=[1,1]  -> nout=16
    B, C, T = 2, 4, 16
    nfilter = 8
    kernels = [3, 5]
    nout = len(kernels) * nfilter

    key = jax.random.PRNGKey(0)
    kx, kx2, *kp = jax.random.split(key, 2 + 2 * len(kernels))
    x = jax.random.normal(kx, (B, C, T), dtype=jnp.float32)

    weights, biases = [], []
    for i, k in enumerate(kernels):
        bound = 1.0 / (C * k) ** 0.5
        w = jax.random.uniform(kp[2 * i], (nfilter, C, k),
                               minval=-bound, maxval=bound, dtype=jnp.float32)
        b = jax.random.uniform(kp[2 * i + 1], (nfilter,),
                               minval=-bound, maxval=bound, dtype=jnp.float32)
        weights.append(w)
        biases.append(b)

    rd = lambda a: a.astype(jnp.bfloat16).astype(jnp.float32)  # bf16-rounded copy for tight check

    # --- small T (internally padded to one lane-aligned 128-wide tile, sliced back) ---
    out = jax.block_until_ready(extend_conv1d_pallas(x, weights, biases, kernels))
    assert out.shape == (B, nout, T), out.shape
    ref_bf = extend_conv1d_ref(rd(x), [rd(w) for w in weights], biases, kernels)
    assert jnp.allclose(out, ref_bf, atol=1e-4, rtol=1e-4), float(jnp.max(jnp.abs(out - ref_bf)))
    ref_f32 = extend_conv1d_ref(x, weights, biases, kernels)
    assert jnp.allclose(out, ref_f32, atol=5e-2, rtol=5e-2), float(jnp.max(jnp.abs(out - ref_f32)))

    # --- multi-tile time axis (exercises resident halo + cross-tile shifted views) ---
    T2 = 384
    x2 = jax.random.normal(kx2, (B, C, T2), dtype=jnp.float32)
    out2 = jax.block_until_ready(
        extend_conv1d_pallas(x2, weights, biases, kernels, t_tile=128))
    assert out2.shape == (B, nout, T2), out2.shape
    ref2_bf = extend_conv1d_ref(rd(x2), [rd(w) for w in weights], biases, kernels)
    assert jnp.allclose(out2, ref2_bf, atol=1e-4, rtol=1e-4), float(jnp.max(jnp.abs(out2 - ref2_bf)))

    # --- bf16 output path (halves the dominant HBM writeback term) ---
    out3 = jax.block_until_ready(
        extend_conv1d_pallas(x2, weights, biases, kernels, t_tile=128, out_dtype=jnp.bfloat16))
    assert out3.dtype == jnp.bfloat16 and out3.shape == (B, nout, T2)
    assert jnp.allclose(out3.astype(jnp.float32), ref2_bf, atol=5e-2, rtol=5e-2)

    # --- unaligned T, B==1, auto tile picker (exercises time padding/slicing + 2-tile split) ---
    T3 = 200
    x3 = jax.random.normal(jax.random.PRNGKey(7), (1, C, T3), dtype=jnp.float32)
    out4 = jax.block_until_ready(extend_conv1d_pallas(x3, weights, biases, kernels))
    assert out4.shape == (1, nout, T3), out4.shape
    ref4_bf = extend_conv1d_ref(rd(x3), [rd(w) for w in weights], biases, kernels)
    assert jnp.allclose(out4, ref4_bf, atol=1e-4, rtol=1e-4), float(jnp.max(jnp.abs(out4 - ref4_bf)))

    print("KERNEL_OK")
</pallas_src>

<mosaic_0001>
module attributes {stable_mosaic.version = 11 : i64} {
  func.func @kernel(%arg0: i32, %arg1: i32, %arg2: memref<1x4x128xf32, #tpu.memory_space<vmem>>, %arg3: memref<2x4x4xf32, #tpu.memory_space<vmem>>, %arg4: memref<5x16x4xbf16, #tpu.memory_space<vmem>>, %arg5: memref<16x1xf32, #tpu.memory_space<vmem>>, %arg6: memref<1x16x128xf32, #tpu.memory_space<vmem>>) attributes {dimension_semantics = [#tpu.dimension_semantics<parallel>, #tpu.dimension_semantics<parallel>], iteration_bounds = array<i64: 2, 1>, scalar_prefetch = 0 : i64, scratch_operands = 0 : i64, tpu.core_type = #tpu.core_type<tc>, window_params = [{transform_indices = @transform_0, window_bounds = array<i64: 1, 4, 128>}, {pipeline_mode = #tpu.pipeline_mode<synchronous>, transform_indices = @transform_1, window_bounds = array<i64: 2, 4, 4>}, {pipeline_mode = #tpu.pipeline_mode<synchronous>, transform_indices = @transform_2, window_bounds = array<i64: 5, 16, 4>}, {pipeline_mode = #tpu.pipeline_mode<synchronous>, transform_indices = @transform_3, window_bounds = array<i64: 16, 1>}, {transform_indices = @transform_4, window_bounds = array<i64: 1, 16, 128>}]} {
    %c0 = arith.constant 0 : index
    %c0_0 = arith.constant 0 : index
    %c0_1 = arith.constant 0 : index
    %0 = vector.load %arg2[%c0, %c0_0, %c0_1] : memref<1x4x128xf32, #tpu.memory_space<vmem>>, vector<1x4x128xf32>
    %1 = vector.shape_cast %0 : vector<1x4x128xf32> to vector<4x128xf32>
    %2 = arith.truncf %1 : vector<4x128xf32> to vector<4x128xbf16>
    %c1_i32 = arith.constant 1 : i32
    %3 = arith.muli %arg0, %c1_i32 : i32
    %4 = arith.addi %3, %arg1 : i32
    %5 = arith.index_cast %4 : i32 to index
    %c0_2 = arith.constant 0 : index
    %c0_3 = arith.constant 0 : index
    %6 = vector.load %arg3[%5, %c0_2, %c0_3] : memref<2x4x4xf32, #tpu.memory_space<vmem>>, vector<1x4x4xf32>
    %7 = vector.shape_cast %6 : vector<1x4x4xf32> to vector<4x4xf32>
    %8 = arith.truncf %7 : vector<4x4xf32> to vector<4x4xbf16>
    %9 = vector.extract_strided_slice %8 {offsets = [0, 0], sizes = [4, 2], strides = [1, 1]} : vector<4x4xbf16> to vector<4x2xbf16>
    %10 = vector.extract_strided_slice %2 {offsets = [0, 0], sizes = [4, 126], strides = [1, 1]} : vector<4x128xbf16> to vector<4x126xbf16>
    %11 = tpu.concatenate %9, %10 in 1 : vector<4x2xbf16>, vector<4x126xbf16> -> vector<4x128xbf16>
    %c0_4 = arith.constant 0 : index
    %c0_5 = arith.constant 0 : index
    %c0_6 = arith.constant 0 : index
    %12 = vector.load %arg4[%c0_4, %c0_5, %c0_6] : memref<5x16x4xbf16, #tpu.memory_space<vmem>>, vector<1x16x4xbf16>
    %13 = vector.shape_cast %12 : vector<1x16x4xbf16> to vector<16x4xbf16>
    %cst = arith.constant dense<0.000000e+00> : vector<16x128xf32>
    %14 = tpu.matmul %13, %11, %cst {dimension_numbers = #tpu.dot_dimension_numbers<[1], [0], [0], [1], [0, 0, 1, 1], [], []>} : vector<16x4xbf16>, vector<4x128xbf16>, vector<16x128xf32> -> vector<16x128xf32>
    %15 = vector.extract_strided_slice %8 {offsets = [0, 1], sizes = [4, 1], strides = [1, 1]} : vector<4x4xbf16> to vector<4x1xbf16>
    %16 = vector.extract_strided_slice %2 {offsets = [0, 0], sizes = [4, 127], strides = [1, 1]} : vector<4x128xbf16> to vector<4x127xbf16>
    %17 = tpu.concatenate %15, %16 in 1 : vector<4x1xbf16>, vector<4x127xbf16> -> vector<4x128xbf16>
    %c1 = arith.constant 1 : index
    %c0_7 = arith.constant 0 : index
    %c0_8 = arith.constant 0 : index
    %18 = vector.load %arg4[%c1, %c0_7, %c0_8] : memref<5x16x4xbf16, #tpu.memory_space<vmem>>, vector<1x16x4xbf16>
    %19 = vector.shape_cast %18 : vector<1x16x4xbf16> to vector<16x4xbf16>
    %cst_9 = arith.constant dense<0.000000e+00> : vector<16x128xf32>
    %20 = tpu.matmul %19, %17, %cst_9 {dimension_numbers = #tpu.dot_dimension_numbers<[1], [0], [0], [1], [0, 0, 1, 1], [], []>} : vector<16x4xbf16>, vector<4x128xbf16>, vector<16x128xf32> -> vector<16x128xf32>
    %21 = arith.addf %14, %20 : vector<16x128xf32>
    %c2 = arith.constant 2 : index
    %c0_10 = arith.constant 0 : index
    %c0_11 = arith.constant 0 : index
    %22 = vector.load %arg4[%c2, %c0_10, %c0_11] : memref<5x16x4xbf16, #tpu.memory_space<vmem>>, vector<1x16x4xbf16>
    %23 = vector.shape_cast %22 : vector<1x16x4xbf16> to vector<16x4xbf16>
    %cst_12 = arith.constant dense<0.000000e+00> : vector<16x128xf32>
    %24 = tpu.matmul %23, %2, %cst_12 {dimension_numbers = #tpu.dot_dimension_numbers<[1], [0], [0], [1], [0, 0, 1, 1], [], []>} : vector<16x4xbf16>, vector<4x128xbf16>, vector<16x128xf32> -> vector<16x128xf32>
    %25 = arith.addf %21, %24 : vector<16x128xf32>
    %26 = vector.extract_strided_slice %2 {offsets = [0, 1], sizes = [4, 127], strides = [1, 1]} : vector<4x128xbf16> to vector<4x127xbf16>
    %27 = vector.extract_strided_slice %8 {offsets = [0, 2], sizes = [4, 1], strides = [1, 1]} : vector<4x4xbf16> to vector<4x1xbf16>
    %28 = tpu.concatenate %26, %27 in 1 : vector<4x127xbf16>, vector<4x1xbf16> -> vector<4x128xbf16>
    %c3 = arith.constant 3 : index
    %c0_13 = arith.constant 0 : index
    %c0_14 = arith.constant 0 : index
    %29 = vector.load %arg4[%c3, %c0_13, %c0_14] : memref<5x16x4xbf16, #tpu.memory_space<vmem>>, vector<1x16x4xbf16>
    %30 = vector.shape_cast %29 : vector<1x16x4xbf16> to vector<16x4xbf16>
    %cst_15 = arith.constant dense<0.000000e+00> : vector<16x128xf32>
    %31 = tpu.matmul %30, %28, %cst_15 {dimension_numbers = #tpu.dot_dimension_numbers<[1], [0], [0], [1], [0, 0, 1, 1], [], []>} : vector<16x4xbf16>, vector<4x128xbf16>, vector<16x128xf32> -> vector<16x128xf32>
    %32 = arith.addf %25, %31 : vector<16x128xf32>
    %33 = vector.extract_strided_slice %2 {offsets = [0, 2], sizes = [4, 126], strides = [1, 1]} : vector<4x128xbf16> to vector<4x126xbf16>
    %34 = vector.extract_strided_slice %8 {offsets = [0, 2], sizes = [4, 2], strides = [1, 1]} : vector<4x4xbf16> to vector<4x2xbf16>
    %35 = tpu.concatenate %33, %34 in 1 : vector<4x126xbf16>, vector<4x2xbf16> -> vector<4x128xbf16>
    %c4 = arith.constant 4 : index
    %c0_16 = arith.constant 0 : index
    %c0_17 = arith.constant 0 : index
    %36 = vector.load %arg4[%c4, %c0_16, %c0_17] : memref<5x16x4xbf16, #tpu.memory_space<vmem>>, vector<1x16x4xbf16>
    %37 = vector.shape_cast %36 : vector<1x16x4xbf16> to vector<16x4xbf16>
    %cst_18 = arith.constant dense<0.000000e+00> : vector<16x128xf32>
    %38 = tpu.matmul %37, %35, %cst_18 {dimension_numbers = #tpu.dot_dimension_numbers<[1], [0], [0], [1], [0, 0, 1, 1], [], []>} : vector<16x4xbf16>, vector<4x128xbf16>, vector<16x128xf32> -> vector<16x128xf32>
    %39 = arith.addf %32, %38 : vector<16x128xf32>
    %c0_19 = arith.constant 0 : index
    %c0_20 = arith.constant 0 : index
    %40 = vector.load %arg5[%c0_19, %c0_20] : memref<16x1xf32, #tpu.memory_space<vmem>>, vector<16x1xf32>
    %41 = vector.broadcast %40 : vector<16x1xf32> to vector<16x128xf32>
    %42 = arith.addf %39, %41 : vector<16x128xf32>
    %c0_21 = arith.constant 0 : index
    %c0_22 = arith.constant 0 : index
    %c0_23 = arith.constant 0 : index
    %43 = vector.load %arg6[%c0_21, %c0_22, %c0_23] : memref<1x16x128xf32, #tpu.memory_space<vmem>>, vector<1x16x128xf32>
    %44 = vector.shape_cast %43 : vector<1x16x128xf32> to vector<16x128xf32>
    %45 = vector.shape_cast %42 : vector<16x128xf32> to vector<1x16x128xf32>
    tpu.vector_store %arg6[%c0_21, %c0_22, %c0_23], %45 {strides = array<i32>} : memref<1x16x128xf32, #tpu.memory_space<vmem>>, vector<1x16x128xf32>,
    return
  }
  func.func @transform_0(%arg0: i32, %arg1: i32) -> (i32, i32, i32) {
    %c0_i32 = arith.constant 0 : i32
    %c0_i32_0 = arith.constant 0 : i32
    return %arg0, %c0_i32, %arg1 : i32, i32, i32
  }
  func.func @transform_1(%arg0: i32, %arg1: i32) -> (i32, i32, i32) {
    %c0_i32 = arith.constant 0 : i32
    %c0_i32_0 = arith.constant 0 : i32
    %c0_i32_1 = arith.constant 0 : i32
    %c0_i32_2 = arith.constant 0 : i32
    return %c0_i32, %c0_i32_0, %c0_i32_1 : i32, i32, i32
  }
  func.func @transform_2(%arg0: i32, %arg1: i32) -> (i32, i32, i32) {
    %c0_i32 = arith.constant 0 : i32
    %c0_i32_0 = arith.constant 0 : i32
    %c0_i32_1 = arith.constant 0 : i32
    %c0_i32_2 = arith.constant 0 : i32
    return %c0_i32, %c0_i32_0, %c0_i32_1 : i32, i32, i32
  }
  func.func @transform_3(%arg0: i32, %arg1: i32) -> (i32, i32) {
    %c0_i32 = arith.constant 0 : i32
    %c0_i32_0 = arith.constant 0 : i32
    %c0_i32_1 = arith.constant 0 : i32
    return %c0_i32, %c0_i32_0 : i32, i32
  }
  func.func @transform_4(%arg0: i32, %arg1: i32) -> (i32, i32, i32) {
    %c0_i32 = arith.constant 0 : i32
    %c0_i32_0 = arith.constant 0 : i32
    return %arg0, %c0_i32, %arg1 : i32, i32, i32
  }
}

</mosaic_0001>

<bundles_post_ra>
// kernel: tpu_custom_call.1
= control target key start
LH: loop header
LB: loop body
LE: loop exit
PB: predicated region body
PF: predicated region fallthrough
CT: control target
= control target key end

     0   :  { %9 = vsyncpa [#allocation3], 0  ;;  %s881_s0 = inlined_call_operand.vmem [shape: f32[2,4,128], index: 0, kind: input, shape index: {}]   ;;  %s882_s1 = inlined_call_operand.vmem [shape: f32[2,4,4], index: 1, kind: input, shape index: {}]   ;;  %s883_s2 = inlined_call_operand.vmem [shape: bf16[5,16,4], index: 2, kind: input, shape index: {}]   ;;  %s884_s3 = inlined_call_operand.vmem [shape: f32[16,1], index: 3, kind: input, shape index: {}]   ;;  %s885_s4 = inlined_call_operand.hbm [shape: f32[2,16,128], index: 4, kind: output, shape index: {}]  }
   0x1   :  { %11 = vsyncpa [#allocation3 + $0x1], 0  ;;  %s749_s15 = smov 0   ;;  %s751_s16 = smov 0  }
   0x2   :  { %s753_s17 = smov 0   ;;  %s755_s18 = smov 0  }
   0x3   :  { %s757_s19 = smov 0   ;;  %s759_s20 = smov 0  }
   0x4 LB: > { %s516_s21 = sadd.s32 4294967295, %s713_s20   ;;  %s517_s22 = sadd.s32 4294967294, %s713_s20   ;;  %s713_s20 = sphi %s759_s20, %s17_s20   ;;  %s709_s19 = sphi %s757_s19, %s892_s19   ;;  %s705_s18 = sphi %s755_s18, %s891_s18   ;;  %s701_s17 = sphi %s753_s17, %s890_s17   ;;  %s697_s16 = sphi %s751_s16, %s889_s16   ;;  %s693_s15 = sphi %s749_s15, %s888_s15  }
   0x5   : > { %s29_s23 = sadd.s32 1, %s709_s19  ;;  %s129_s24 = sadd.s32 1, %s701_s17 }
   0x6   : > { %p31_p0 = scmp.ge.s32.totalorder %s29_s23, 2  ;;  %p139_p1 = scmp.ne.s32.totalorder %s701_s17, %s697_s16 }
   0x7   : > { %p140_p2 = scmp.eq.s32.totalorder %s516_s21, 1  ;;  %p145_p3 = scmp.ne.s32.totalorder %s697_s16, %s693_s15 }
   0x8   : > { %s894_s23 = smov (%p31_p0, %s29_s23), 0  ;;  %p146_p5 = scmp.eq.s32.totalorder %s517_s22, 1 }
   0x9   : > { %p789_p4 = por %p140_p2, %p139_p1  ;;  %s124_s26 = ssub.s32 %s709_s19, %s894_s23 }
   0xa   : > { %p520_p6 = scmp.ge.s32.totalorder %s713_s20, 1  ;;  %p127_p7 = scmp.eq.s32.totalorder %s124_s26, 0 }
   0xb   : > { %p796_p8 = por %p146_p5, %p145_p3  ;;  %p183_p9 = scmp.lt.s32.totalorder %s713_s20, 3 }
   0xc   : > { %s802_s28 = scalar_select %p127_p7, %s701_s17, %s129_s24  }
   0xd   : > { %p184_p10 = pnand %p520_p6, %p183_p9 }
   0xe   : > { %s523_s29 = sshll.u32 (!%p184_p10), %s705_s18, 2  ;;  %p211_p11 = scmp.lt.s32.totalorder (!%p184_p10), %s705_s18, 1 }
   0xf   : > { %187 = sbr.rel (%p184_p10) target bundleno = 313 (0x139), region = 36  ;;  %s223_s6 = scalar_lea.vmem (!%p184_p10), %s882_s1, %s523_s29 }
  0x10   : > { %s715_s12 = smov (!%p184_p10), 127   ;;  %s716_s13 = smov (!%p184_p10), 2  }
  0x11   : > { %s717_s14 = smov (!%p184_p10), 1   ;;  %s718_s21 = smov (!%p184_p10), 125  }
  0x12   : > { %s719_s22 = smov (!%p184_p10), 126   ;;  %s720_s24 = smov (!%p184_p10), 124  }
  0x13   : > { %s567_s26 = sshll.u32 (!%p184_p10), %s705_s18, 4 }
  0x14   : > { %v224_v0 = vld [vmem:[%s223_s6] sm:$0xf]  ;;  %s212_s7 = scalar_select %p211_p11, %s705_s18, 1  ;;  %vm260_vm0 = vcmask 1041408   ;;  %vm256_vm1 = vcmask 31744   ;;  %v564_v9 = vld [vmem:[%s883_s2 + $0x10] sm:$0xff] }
  0x15   : > { %v225_v1 = vpack.c.bf16 %v224_v0, %v224_v0  ;;  %vm231_vm2 = vcmask 15360   ;;  %v562_v13 = vld [vmem:[%s883_s2] sm:$0xff]  ;;  %v406_v15 = vld [vmem:[%s884_s3 + $0x8] sm:$0xff]  ;;  %v721_v16 = vmov 0   ;;  %vm244_vm3 = vcmask 7168   ;;  %v565_v27 = vld [vmem:[%s883_s2 + $0x18] sm:$0xff]  ;;  %s434_s6 = scalar_lea.hbm %s885_s4, %s567_s26 }
  0x16   : > { %s522_s8 = sshll.u32 %s212_s7, 2  ;;  %v405_v14 = vld [vmem:[%s884_s3] sm:$0xff]  ;;  %632 = vset.pattern.permute.xlu1 %v721_v16  ;;  %633 = vset.pattern.permute.xlu2 %v721_v16  ;;  %v563_v22 = vld [vmem:[%s883_s2 + $0x8] sm:$0xff]  ;;  %vm335_vm4 = vcmask 1039360   ;;  %vm372_vm5 = vcmask 1031168  }
  0x17   : > { %v238_v2 = vunpack.c.l.b16 %v225_v1  ;;  %s217_s11 = scalar_lea.vmem %s881_s0, %s522_s8  ;;  %634 = vset.pattern.permute.xlu0 %v721_v16  ;;  %v566_v31 = vld [vmem:[%s883_s2 + $0x20] sm:$0xff]  ;;  %s437_s8 = sshll.u32 %s434_s6, 4  ;;  %s438_s8 = int_to_ptr.hbm [resolvable:$true] %s437_s8 }
  0x18   : > { %v219_v4 = vld [vmem:[%s217_s11] sm:$0xf]  ;;  %s649_s9 = sshra.s32 %s438_s8, 4  ;;  %s650_s9 = int_to_ptr.hbm [resolvable:$true] %s649_s9 }
  0x19   : > { %v239_v3 = vpack.c.b16 %v238_v2, %v238_v2  ;;  %v220_v5 = vpack.c.bf16 %v219_v4, %v219_v4  ;;  %s651_s10 = scalar_lea.hbm %s650_s9, 16  ;;  %p656_p1 = scmp.lt.s32.totalorder %s650_s9, %s885_s4 }
  0x1a   : > { %p652_p12 = scmp.ne.s32.totalorder %s650_s9, %s651_s10 }
  0x1b   : > { %240 = vrot.lane.b32.xlu0 %v239_v3, %s715_s12  ;;  %v227_v6 = vunpack.c.l.b16 %v220_v5  ;;  %v313_v8 = vsel %vm260_vm0, %v220_v5, 0 }
  0x1c   : > { %322 = vmatpush.bf16.msra.mxu2 %v313_v8  ;;  %p653_p13 = pnand %p652_p12, %p789_p4 }
  0x1d   : > { %v228_v7 = vpack.c.b16 %v227_v6, %v227_v6 }
  0x1e   : > { %p654_p0 = pneg %p653_p13 }
  0x1f   : > { %331 = vrot.lane.b32.xlu1 %v228_v7, %s715_s12  ;;  %229 = vrot.lane.b32.xlu2 %v228_v7, %s716_s13  ;;  %s655_s13 = scalar_lea.hbm %s885_s4, 32 }
  0x20   : > { %542 = vmatmul.msk.bf16.vlgmr.msra.gmra.mxu2 %vm256_vm1, %v564_v9  ;;  %p657_p2 = scmp.lt.s32.totalorder %s655_s13, %s651_s10 }
  0x22   : > { %p658_p3 = por %p657_p2, %p656_p1 }
  0x23   : > { %242 = vrot.lane.b32.xlu0 %v228_v7, %s717_s14 }
  0x24   : > { %p659_p5 = pnand %p658_p3, %p654_p0 }
  0x27   : > { %333 = vrot.lane.b32.xlu1 %v239_v3, %s718_s21  ;;  %368 = vrot.lane.b32.xlu2 %v228_v7, %s719_s22  ;;  %s208_s22 = sand.u32 1, %s697_s16  }
  0x28   : > { %s422_s18 = scalar_lea.sflag [#allocation3], %s208_s22 }
  0x2b   : > { %370 = vrot.lane.b32.xlu0 %v239_v3, %s720_s24  ;;  %s521_s24 = sshll.u32 %s208_s22, 4 }
  0x2c   : > { %s210_s29 = scalar_lea.vmem [#allocation2], %s521_s24 }
  0x2d   : > { %s435_s7 = sshll.u32 %s210_s29, 4  ;;  %s436_s7 = int_to_ptr.vmem [resolvable:$true] %s435_s7 }
  0x2f   : > { %409 = vperm.xlu1 %632, %v405_v14   ;;  %414 = vperm.xlu2 %633, %v406_v15  }
  0x79   : > { %v230_v10 = vpop.permute.xlu2 %229 }
  0x7a   : > { %v234_v11 = vsel %vm231_vm2, %v225_v1, %v230_v10 }
  0x7b   : > { %v285_v12 = vsel %vm260_vm0, %v234_v11, 0 }
  0x7c   : > { %294 = vmatpush.bf16.msra.mxu1 %v285_v12 }
  0x7f   : > { %535 = vmatmul.msk.bf16.vlgmr.msra.gmra.mxu1 %vm256_vm1, %v562_v13 }
  0x81   : > { %v369_v25 = vpop.permute.xlu2 %368 }
  0x89   : > { %v415_v51 = vpop.permute.xlu2 %414 }
  0x8d   : > { %v241_v17 = vpop.permute.xlu0 %240 }
  0x91   : > { %v332_v18 = vpop.permute.xlu1 %331 }
  0x95   : > { %v243_v19 = vpop.permute.xlu0 %242 }
  0x96   : > { %v247_v20 = vsel %vm244_vm3, %v241_v17, %v243_v19 }
  0x97   : > { %v261_v21 = vsel %vm260_vm0, %v247_v20, 0 }
  0x98   : > { %270 = vmatpush.bf16.msra.mxu0 %v261_v21 }
  0x99   : > { %v334_v23 = vpop.permute.xlu1 %333 }
  0x9a   : > { %v338_v24 = vsel %vm335_vm4, %v332_v18, %v334_v23 }
  0x9b   : > { %530 = vmatmul.msk.bf16.vlgmr.msra.gmra.mxu0 %vm256_vm1, %v563_v22  ;;  %v350_v26 = vsel %vm260_vm0, %v338_v24, 0 }
  0x9c   : > { %359 = vmatpush.bf16.msra.mxu3 %v350_v26 }
  0x9d   : > { %v371_v28 = vpop.permute.xlu0 %370 }
  0x9e   : > { %v375_v29 = vsel %vm372_vm5, %v369_v25, %v371_v28 }
  0x9f   : > { %v387_v30 = vsel %vm260_vm0, %v375_v29, 0  ;;  %549 = vmatmul.msk.bf16.vlgmr.msra.gmra.mxu3 %vm256_vm1, %v565_v27 }
  0xa0   : > { %396 = vmatpush.bf16.msrb.mxu0 %v387_v30 }
  0xa1   : > { %v410_v42 = vpop.permute.xlu1 %409 }
  0xa3   : > { %v324_v34 = vpop.f32.mrf.mxu2 }
  0xab   : > { %556 = vmatmul.msk.bf16.vlgmr.msrb.gmra.mxu0 %vm256_vm1, %v566_v31  ;;  %v326_v45 = vpop.f32.mrf.mxu2 }
  0xfc   : > { %v296_v33 = vpop.f32.mrf.mxu1 }
 0x104   : > { %v298_v39 = vpop.f32.mrf.mxu1 }
 0x118   : > { %v272_v32 = vpop.f32.mrf.mxu0 }
 0x119   : > { %v297_v36 = vadd.f32 %v296_v33, %v272_v32 }
 0x11b   : > { %v329_v38 = vadd.f32 %v324_v34, %v297_v36 }
 0x120   : > { %v274_v35 = vpop.f32.mrf.mxu0 }
 0x121   : > { %v299_v43 = vadd.f32 %v298_v39, %v274_v35 }
 0x122   : > { %v361_v37 = vpop.f32.mrf.mxu3 }
 0x123   : > { %v366_v40 = vadd.f32 %v361_v37, %v329_v38  ;;  %v330_v48 = vadd.f32 %v326_v45, %v299_v43 }
 0x128   : > { %v398_v41 = vpop.f32.mrf.mxu0 }
 0x129   : > { %v403_v44 = vadd.f32 %v398_v41, %v366_v40 }
 0x12a   : > { %v363_v47 = vpop.f32.mrf.mxu3 }
 0x12b   : > { %v417_v46 = vadd.f32 %v410_v42, %v403_v44  ;;  %v367_v49 = vadd.f32 %v363_v47, %v330_v48 }
 0x12d   : > { %419 = vst [vmem:[%s210_s29] sm:$0xff] %v417_v46 }
 0x130   : > { %v400_v50 = vpop.f32.mrf.mxu0 }
 0x131   : > { %v404_v52 = vadd.f32 %v400_v50, %v367_v49 }
 0x133   : > { %v418_v53 = vadd.f32 %v415_v51, %v404_v52 }
 0x135   : > { %420 = vst [vmem:[%s210_s29 + $0x8] sm:$0xff] %v418_v53 }
 0x136   : > { %662 = shalt.err (!%p659_p5)
}
 0x137   : > { %s722_s22 = smov 128   ;;  %s723_s24 = smov 8  }
 0x138   : > { %568 = dma.vmem_to_hbm [thread:$0]  (%p789_p4), %s436_s7, 256, %s438_s8, %s422_s18, %s722_s22, %s722_s22, %s723_s24  }
 0x139 PF: > { %p574_p6 = scmp.ge.s32.totalorder %s713_s20, 2  ;;  %s452_s26 = sand.u32 1, %s693_s15  }
 0x13a   : > { %s453_s29 = scalar_lea.sflag [#allocation3], %s452_s26 }
 0x13b   : > { %p571_p7 = pnand %p574_p6, %p796_p8 }
 0x13d   : > { %p572_p9 = pneg %p571_p7 }
 0x13f   : > { %688 = dma.done.wait (%p572_p9), %s453_s29, 256  }
 0x140   : > { %690 = vsyncadd (%p572_p9), %s453_s29, 4294967040  ;;  %s17_s20 = sadd.s32 1, %s713_s20   ;;  %s888_s15 = smov %s697_s16 }
 0x141   : > { %p14_p10 = scmp.ge.s32.totalorder %s17_s20, 4   ;;  %s889_s16 = smov %s701_s17 }
 0x142   : > { %s890_s17 = smov %s802_s28  ;;  %s891_s18 = smov %s709_s19 }
 0x143   : > { %s892_s19 = smov %s894_s23  ;;  %16 = sbr.rel (!%p14_p10) target bundleno = 4 (0x4), region = 76 }
 0x148   :  { %459 = vsyncpa [#allocation3], 1 }
 0x149   :  { %461 = vsyncpa [#allocation3 + $0x1], 1 }

</bundles_post_ra>
